<compile_context>
chip_gen: v7x
topology: tpu7x:2x2x1
jax: 0.10.0
libtpu: 0.0.40
codegen_flags: <defaults>
</compile_context>

<pallas_src>
import jax
import jax.numpy as jnp
from jax.experimental import pallas as pl
from jax.experimental.pallas import tpu as pltpu


def _round_up(n, m):
    return ((n + m - 1) // m) * m


def parser_mlp_kernel(x_ref, w1_ref, b1_ref, w2_ref, b2_ref, out_ref):
    # Layer 1: (BM, K) bf16 @ (K, Hp) bf16 -> f32 accumulate on the MXU.
    h = jnp.dot(x_ref[...], w1_ref[...], preferred_element_type=jnp.float32)
    h = jnp.maximum(h + b1_ref[...], 0.0)            # (BM, Hp) + (1, Hp) broadcast, ReLU
    # Layer 2: (BM, Hp) bf16 @ (Hp, Cp) bf16 -> f32 logits (lane-dense Cp=128 store).
    logits = jnp.dot(h.astype(jnp.bfloat16), w2_ref[...],
                     preferred_element_type=jnp.float32)
    out_ref[...] = (logits + b2_ref[...]).astype(out_ref.dtype)


def make_parser_forward(embeddings, W1, b1, W2, b2, *, bm_cap=128):
    """One-time parameter prep (padding / bf16 cast / bias reshape), returns a jitted forward."""
    in_dim, hidden = W1.shape
    n_classes = W2.shape[1]

    K = _round_up(in_dim, 128)        # 1152 -> 1152 (already lane aligned)
    Hp = _round_up(hidden, 128)       # 200  -> 256  (full MXU N tiles, dense lanes)
    Cp = _round_up(n_classes, 128)    # 3    -> 128  (unmasked lane-dense output store)

    emb_bf = jnp.asarray(embeddings).astype(jnp.bfloat16)
    W1p = jnp.zeros((K, Hp), jnp.bfloat16).at[:in_dim, :hidden].set(
        jnp.asarray(W1).astype(jnp.bfloat16))
    b1p = jnp.zeros((1, Hp), jnp.float32).at[:, :hidden].set(
        jnp.asarray(b1).astype(jnp.float32).reshape(1, -1))
    W2p = jnp.zeros((Hp, Cp), jnp.bfloat16).at[:hidden, :n_classes].set(
        jnp.asarray(W2).astype(jnp.bfloat16))
    b2p = jnp.zeros((1, Cp), jnp.float32).at[:, :n_classes].set(
        jnp.asarray(b2).astype(jnp.float32).reshape(1, -1))

    @jax.jit
    def forward(w):
        batch = w.shape[0]
        # Embedding lookup (torch.index_select equivalent) in bf16; fuses into the
        # same XLA program as the Pallas call under jit.
        x = jnp.take(emb_bf, w.reshape(-1), axis=0).reshape(batch, in_dim)
        if K != in_dim:
            x = jnp.pad(x, ((0, 0), (0, K - in_dim)))

        # Batch tiling: block rows a multiple of 8, capped at bm_cap; weights stay
        # resident (constant index_map); batch axis is "parallel".
        BM = bm_cap if batch >= bm_cap else _round_up(batch, 8)
        B_pad = _round_up(batch, BM)
        if B_pad != batch:
            x = jnp.pad(x, ((0, B_pad - batch), (0, 0)))

        out = pl.pallas_call(
            parser_mlp_kernel,
            out_shape=jax.ShapeDtypeStruct((B_pad, Cp), jnp.float32),
            grid=(B_pad // BM,),
            in_specs=[
                pl.BlockSpec((BM, K), lambda i: (i, 0)),   # x tile per grid step
                pl.BlockSpec((K, Hp), lambda i: (0, 0)),   # W1 resident
                pl.BlockSpec((1, Hp), lambda i: (0, 0)),   # b1 resident
                pl.BlockSpec((Hp, Cp), lambda i: (0, 0)),  # W2 resident
                pl.BlockSpec((1, Cp), lambda i: (0, 0)),   # b2 resident
            ],
            out_specs=pl.BlockSpec((BM, Cp), lambda i: (i, 0)),
            compiler_params=pltpu.CompilerParams(
                dimension_semantics=("parallel",)),
        )(x, W1p, b1p, W2p, b2p)

        return out[:batch, :n_classes]

    return forward


def xavier_uniform(key, shape, dtype=jnp.float32):
    fan_in, fan_out = shape
    limit = (6.0 / (fan_in + fan_out)) ** 0.5
    return jax.random.uniform(key, shape, dtype, minval=-limit, maxval=limit)


if __name__ == "__main__":
    # Small, module-consistent shapes.
    num_words = 100
    embed_size = 32
    n_features = 36
    hidden_size = 200
    n_classes = 3
    batch = 8

    key = jax.random.PRNGKey(0)
    k_emb, k_w1, k_b1, k_w2, k_b2, k_tok = jax.random.split(key, 6)

    # Deterministic parameter init (mirrors reset_params: xavier_uniform_ + uniform_).
    embeddings = jax.random.normal(k_emb, (num_words, embed_size), jnp.float32)
    W1 = xavier_uniform(k_w1, (n_features * embed_size, hidden_size))
    b1 = jax.random.uniform(k_b1, (hidden_size,), jnp.float32)
    W2 = xavier_uniform(k_w2, (hidden_size, n_classes))
    b2 = jax.random.uniform(k_b2, (n_classes,), jnp.float32)

    # Input token indices (batch, n_features).
    w = jax.random.randint(k_tok, (batch, n_features), 0, num_words, jnp.int32)

    forward = make_parser_forward(embeddings, W1, b1, W2, b2)
    logits = forward(w)
    jax.block_until_ready(logits)
    assert logits.shape == (batch, n_classes)

    # Reference with the same bf16-weight / f32-accumulate math (plain JAX).
    emb_bf = embeddings.astype(jnp.bfloat16)
    x_bf = jnp.take(emb_bf, w.reshape(-1), axis=0).reshape(batch, -1)
    h_ref = jnp.maximum(
        jnp.dot(x_bf, W1.astype(jnp.bfloat16), preferred_element_type=jnp.float32) + b1, 0.0)
    ref_bf = jnp.dot(h_ref.astype(jnp.bfloat16), W2.astype(jnp.bfloat16),
                     preferred_element_type=jnp.float32) + b2
    assert jnp.allclose(logits, ref_bf, atol=2e-2, rtol=2e-2), \
        float(jnp.max(jnp.abs(logits - ref_bf)))

    # Loose sanity check against the full-f32 reference (bf16 quantization noise only).
    x_f32 = jnp.take(embeddings, w.reshape(-1), axis=0).reshape(batch, -1)
    ref_f32 = jnp.maximum(x_f32 @ W1 + b1, 0.0) @ W2 + b2
    assert jnp.allclose(logits, ref_f32, atol=0.3, rtol=0.05), \
        float(jnp.max(jnp.abs(logits - ref_f32)))

    print("KERNEL_OK")
</pallas_src>

<mosaic_0001>
module attributes {stable_mosaic.version = 11 : i64} {
  func.func @parser_mlp_kernel(%arg0: i32, %arg1: memref<8x1152xbf16, #tpu.memory_space<vmem>>, %arg2: memref<1152x256xbf16, #tpu.memory_space<vmem>>, %arg3: memref<1x256xf32, #tpu.memory_space<vmem>>, %arg4: memref<256x128xbf16, #tpu.memory_space<vmem>>, %arg5: memref<1x128xf32, #tpu.memory_space<vmem>>, %arg6: memref<8x128xf32, #tpu.memory_space<vmem>>) attributes {dimension_semantics = [#tpu.dimension_semantics<parallel>], iteration_bounds = array<i64: 1>, scalar_prefetch = 0 : i64, scratch_operands = 0 : i64, tpu.core_type = #tpu.core_type<tc>, window_params = [{transform_indices = @transform_0, window_bounds = array<i64: 8, 1152>}, {pipeline_mode = #tpu.pipeline_mode<synchronous>, transform_indices = @transform_1, window_bounds = array<i64: 1152, 256>}, {pipeline_mode = #tpu.pipeline_mode<synchronous>, transform_indices = @transform_2, window_bounds = array<i64: 1, 256>}, {pipeline_mode = #tpu.pipeline_mode<synchronous>, transform_indices = @transform_3, window_bounds = array<i64: 256, 128>}, {pipeline_mode = #tpu.pipeline_mode<synchronous>, transform_indices = @transform_4, window_bounds = array<i64: 1, 128>}, {transform_indices = @transform_5, window_bounds = array<i64: 8, 128>}]} {
    %c0 = arith.constant 0 : index
    %c0_0 = arith.constant 0 : index
    %0 = vector.load %arg1[%c0, %c0_0] : memref<8x1152xbf16, #tpu.memory_space<vmem>>, vector<8x1152xbf16>
    %c0_1 = arith.constant 0 : index
    %c0_2 = arith.constant 0 : index
    %1 = vector.load %arg2[%c0_1, %c0_2] : memref<1152x256xbf16, #tpu.memory_space<vmem>>, vector<1152x256xbf16>
    %cst = arith.constant dense<0.000000e+00> : vector<8x256xf32>
    %2 = tpu.matmul %0, %1, %cst {dimension_numbers = #tpu.dot_dimension_numbers<[1], [0], [0], [1], [0, 0, 1, 1], [], []>} : vector<8x1152xbf16>, vector<1152x256xbf16>, vector<8x256xf32> -> vector<8x256xf32>
    %c0_3 = arith.constant 0 : index
    %c0_4 = arith.constant 0 : index
    %3 = vector.load %arg3[%c0_3, %c0_4] : memref<1x256xf32, #tpu.memory_space<vmem>>, vector<1x256xf32>
    %4 = vector.broadcast %3 : vector<1x256xf32> to vector<8x256xf32>
    %5 = arith.addf %2, %4 : vector<8x256xf32>
    %cst_5 = arith.constant 0.000000e+00 : f32
    %6 = vector.broadcast %cst_5 : f32 to vector<8x256xf32>
    %7 = arith.maximumf %5, %6 : vector<8x256xf32>
    %8 = arith.truncf %7 : vector<8x256xf32> to vector<8x256xbf16>
    %c0_6 = arith.constant 0 : index
    %c0_7 = arith.constant 0 : index
    %9 = vector.load %arg4[%c0_6, %c0_7] : memref<256x128xbf16, #tpu.memory_space<vmem>>, vector<256x128xbf16>
    %cst_8 = arith.constant dense<0.000000e+00> : vector<8x128xf32>
    %10 = tpu.matmul %8, %9, %cst_8 {dimension_numbers = #tpu.dot_dimension_numbers<[1], [0], [0], [1], [0, 0, 1, 1], [], []>} : vector<8x256xbf16>, vector<256x128xbf16>, vector<8x128xf32> -> vector<8x128xf32>
    %c0_9 = arith.constant 0 : index
    %c0_10 = arith.constant 0 : index
    %11 = vector.load %arg5[%c0_9, %c0_10] : memref<1x128xf32, #tpu.memory_space<vmem>>, vector<1x128xf32>
    %12 = vector.broadcast %11 : vector<1x128xf32> to vector<8x128xf32>
    %13 = arith.addf %10, %12 : vector<8x128xf32>
    %c0_11 = arith.constant 0 : index
    %c0_12 = arith.constant 0 : index
    %14 = vector.load %arg6[%c0_11, %c0_12] : memref<8x128xf32, #tpu.memory_space<vmem>>, vector<8x128xf32>
    tpu.vector_store %arg6[%c0_11, %c0_12], %13 {strides = array<i32>} : memref<8x128xf32, #tpu.memory_space<vmem>>, vector<8x128xf32>,
    return
  }
  func.func @transform_0(%arg0: i32) -> (i32, i32) {
    %c0_i32 = arith.constant 0 : i32
    %c0_i32_0 = arith.constant 0 : i32
    return %arg0, %c0_i32 : i32, i32
  }
  func.func @transform_1(%arg0: i32) -> (i32, i32) {
    %c0_i32 = arith.constant 0 : i32
    %c0_i32_0 = arith.constant 0 : i32
    %c0_i32_1 = arith.constant 0 : i32
    return %c0_i32, %c0_i32_0 : i32, i32
  }
  func.func @transform_2(%arg0: i32) -> (i32, i32) {
    %c0_i32 = arith.constant 0 : i32
    %c0_i32_0 = arith.constant 0 : i32
    %c0_i32_1 = arith.constant 0 : i32
    return %c0_i32, %c0_i32_0 : i32, i32
  }
  func.func @transform_3(%arg0: i32) -> (i32, i32) {
    %c0_i32 = arith.constant 0 : i32
    %c0_i32_0 = arith.constant 0 : i32
    %c0_i32_1 = arith.constant 0 : i32
    return %c0_i32, %c0_i32_0 : i32, i32
  }
  func.func @transform_4(%arg0: i32) -> (i32, i32) {
    %c0_i32 = arith.constant 0 : i32
    %c0_i32_0 = arith.constant 0 : i32
    %c0_i32_1 = arith.constant 0 : i32
    return %c0_i32, %c0_i32_0 : i32, i32
  }
  func.func @transform_5(%arg0: i32) -> (i32, i32) {
    %c0_i32 = arith.constant 0 : i32
    %c0_i32_0 = arith.constant 0 : i32
    return %arg0, %c0_i32 : i32, i32
  }
}

</mosaic_0001>

<bundles_post_ra>
// kernel: forward.1
= control target key start
LH: loop header
LB: loop body
LE: loop exit
PB: predicated region body
PF: predicated region fallthrough
CT: control target
= control target key end

     0   :  { %s2320_s1 = inlined_call_operand.vmem [shape: bf16[1152,256], index: 1, kind: input, shape index: {}]   ;;  %s2321_s0 = inlined_call_operand.vmem [shape: bf16[8,1152], index: 0, kind: input, shape index: {}]   ;;  %s2322_s3 = inlined_call_operand.vmem [shape: bf16[256,128], index: 3, kind: input, shape index: {}]   ;;  %s2323_s2 = inlined_call_operand.vmem [shape: f32[1,256], index: 2, kind: input, shape index: {}]   ;;  %s2324_s4 = inlined_call_operand.vmem [shape: f32[1,128], index: 4, kind: input, shape index: {}]   ;;  %s2325_s5 = inlined_call_operand.vmem [shape: f32[8,128], index: 5, kind: output, shape index: {}]  }
   0x1   :  { %v1532_v0 = vld [vmem:[%s2320_s1 + $0x4] ss:$8 sps:$4 sm:$0xff]   ;;  %v1536_v2 = vld [vmem:[%s2320_s1] ss:$8 sps:$4 sm:$0xff]   ;;  %v1538_v4 = vld [vmem:[%s2320_s1 + $0x14] ss:$8 sps:$4 sm:$0xff]  }
   0x2   :  { %v1534_v1 = vld [vmem:[%s2320_s1 + $0x204] ss:$8 sps:$4 sm:$0xff]   ;;  %934 = vmatprep.subr.bf16.mxu1 %v1532_v0  ;;  %v1537_v3 = vld [vmem:[%s2320_s1 + $0x200] ss:$8 sps:$4 sm:$0xff]   ;;  %v1540_v5 = vld [vmem:[%s2320_s1 + $0x214] ss:$8 sps:$4 sm:$0xff]  }
   0x3   :  { %1016 = vmatprep.subr.bf16.mxu0 %v1534_v1  ;;  %935 = vmatpush1.bf16.msra.mxu1 %v1536_v2  ;;  %v1542_v6 = vld [vmem:[%s2320_s1 + $0x10] ss:$8 sps:$4 sm:$0xff]   ;;  %v1544_v8 = vld [vmem:[%s2320_s1 + $0x24] ss:$8 sps:$4 sm:$0xff]   ;;  %v1548_v10 = vld [vmem:[%s2320_s1 + $0x20] ss:$8 sps:$4 sm:$0xff]  }
   0x4   :  { %1017 = vmatpush1.bf16.msra.mxu0 %v1537_v3  ;;  %936 = vmatprep.subr.bf16.mxu1 %v1538_v4  ;;  %v1543_v7 = vld [vmem:[%s2320_s1 + $0x210] ss:$8 sps:$4 sm:$0xff]   ;;  %v1546_v9 = vld [vmem:[%s2320_s1 + $0x224] ss:$8 sps:$4 sm:$0xff]   ;;  %v1549_v11 = vld [vmem:[%s2320_s1 + $0x220] ss:$8 sps:$4 sm:$0xff]  }
   0x5   :  { %1018 = vmatprep.subr.bf16.mxu0 %v1540_v5  ;;  %v1550_v12 = vld [vmem:[%s2320_s1 + $0x34] ss:$8 sps:$4 sm:$0xff]   ;;  %v1554_v14 = vld [vmem:[%s2320_s1 + $0x30] ss:$8 sps:$4 sm:$0xff]   ;;  %v1556_v16 = vld [vmem:[%s2320_s1 + $0x44] ss:$8 sps:$4 sm:$0xff]  }
   0x6   :  { %v1552_v13 = vld [vmem:[%s2320_s1 + $0x234] ss:$8 sps:$4 sm:$0xff]   ;;  %v1555_v15 = vld [vmem:[%s2320_s1 + $0x230] ss:$8 sps:$4 sm:$0xff]   ;;  %v1558_v17 = vld [vmem:[%s2320_s1 + $0x244] ss:$8 sps:$4 sm:$0xff]  }
   0x7   :  { %937 = vmatpush1.bf16.msra.mxu1 %v1542_v6  ;;  %v1560_v18 = vld [vmem:[%s2320_s1 + $0x40] ss:$8 sps:$4 sm:$0xff]   ;;  %v1562_v20 = vld [vmem:[%s2320_s1 + $0x54] ss:$8 sps:$4 sm:$0xff]   ;;  %v1566_v22 = vld [vmem:[%s2320_s1 + $0x50] ss:$8 sps:$4 sm:$0xff]  }
   0x8   :  { %1019 = vmatpush1.bf16.msra.mxu0 %v1543_v7  ;;  %938 = vmatprep.subr.bf16.mxu1 %v1544_v8  ;;  %v1561_v19 = vld [vmem:[%s2320_s1 + $0x240] ss:$8 sps:$4 sm:$0xff]   ;;  %v1564_v21 = vld [vmem:[%s2320_s1 + $0x254] ss:$8 sps:$4 sm:$0xff]   ;;  %v1567_v23 = vld [vmem:[%s2320_s1 + $0x250] ss:$8 sps:$4 sm:$0xff]  }
   0x9   :  { %1020 = vmatprep.subr.bf16.mxu0 %v1546_v9  ;;  %v1568_v24 = vld [vmem:[%s2320_s1 + $0x64] ss:$8 sps:$4 sm:$0xff]   ;;  %v1572_v26 = vld [vmem:[%s2320_s1 + $0x60] ss:$8 sps:$4 sm:$0xff]   ;;  %v1574_v28 = vld [vmem:[%s2320_s1 + $0x74] ss:$8 sps:$4 sm:$0xff]  }
   0xa   :  { %v1570_v25 = vld [vmem:[%s2320_s1 + $0x264] ss:$8 sps:$4 sm:$0xff]   ;;  %v1573_v27 = vld [vmem:[%s2320_s1 + $0x260] ss:$8 sps:$4 sm:$0xff]   ;;  %v1576_v29 = vld [vmem:[%s2320_s1 + $0x274] ss:$8 sps:$4 sm:$0xff]  }
   0xb   :  { %939 = vmatpush1.bf16.msra.mxu1 %v1548_v10  ;;  %v1578_v30 = vld [vmem:[%s2320_s1 + $0x70] ss:$8 sps:$4 sm:$0xff]   ;;  %v1580_v32 = vld [vmem:[%s2320_s1 + $0x84] ss:$8 sps:$4 sm:$0xff]   ;;  %v1584_v34 = vld [vmem:[%s2320_s1 + $0x80] ss:$8 sps:$4 sm:$0xff]  }
   0xc   :  { %1021 = vmatpush1.bf16.msra.mxu0 %v1549_v11  ;;  %940 = vmatprep.subr.bf16.mxu1 %v1550_v12  ;;  %v1579_v31 = vld [vmem:[%s2320_s1 + $0x270] ss:$8 sps:$4 sm:$0xff]   ;;  %v1582_v33 = vld [vmem:[%s2320_s1 + $0x284] ss:$8 sps:$4 sm:$0xff]   ;;  %v1585_v35 = vld [vmem:[%s2320_s1 + $0x280] ss:$8 sps:$4 sm:$0xff]  }
   0xd   :  { %1022 = vmatprep.subr.bf16.mxu0 %v1552_v13  ;;  %v1586_v36 = vld [vmem:[%s2320_s1 + $0x94] ss:$8 sps:$4 sm:$0xff]   ;;  %v1590_v38 = vld [vmem:[%s2320_s1 + $0x90] ss:$8 sps:$4 sm:$0xff]   ;;  %v1592_v40 = vld [vmem:[%s2320_s1 + $0xa4] ss:$8 sps:$4 sm:$0xff]  }
   0xe   :  { %v1588_v37 = vld [vmem:[%s2320_s1 + $0x294] ss:$8 sps:$4 sm:$0xff]   ;;  %v1591_v39 = vld [vmem:[%s2320_s1 + $0x290] ss:$8 sps:$4 sm:$0xff]   ;;  %v1594_v41 = vld [vmem:[%s2320_s1 + $0x2a4] ss:$8 sps:$4 sm:$0xff]  }
   0xf   :  { %941 = vmatpush1.bf16.msra.mxu1 %v1554_v14  ;;  %v1596_v42 = vld [vmem:[%s2320_s1 + $0xa0] ss:$8 sps:$4 sm:$0xff]   ;;  %v1598_v44 = vld [vmem:[%s2320_s1 + $0xb4] ss:$8 sps:$4 sm:$0xff]   ;;  %v1602_v47 = vld [vmem:[%s2320_s1 + $0xb0] ss:$8 sps:$4 sm:$0xff]  }
  0x10   :  { %1023 = vmatpush1.bf16.msra.mxu0 %v1555_v15  ;;  %942 = vmatprep.subr.bf16.mxu1 %v1556_v16  ;;  %v1597_v43 = vld [vmem:[%s2320_s1 + $0x2a0] ss:$8 sps:$4 sm:$0xff]   ;;  %v1600_v45 = vld [vmem:[%s2320_s1 + $0x2b4] ss:$8 sps:$4 sm:$0xff]   ;;  %v1603_v49 = vld [vmem:[%s2320_s1 + $0x2b0] ss:$8 sps:$4 sm:$0xff]  }
  0x11   :  { %1024 = vmatprep.subr.bf16.mxu0 %v1558_v17  ;;  %v21_v46 = vld [vmem:[%s2321_s0] sm:$0xff]  ;;  %v23_v50 = vld [vmem:[%s2321_s0 + $0x10] sm:$0xff] }
  0x12   :  { %v1324_v48 = vcombine.high %v21_v46, %v21_v46  ;;  %v1604_v51 = vld [vmem:[%s2320_s1 + $0xc4] ss:$8 sps:$4 sm:$0xff]   ;;  %v1328_v53 = vcombine.high %v23_v50, %v23_v50  ;;  %v1608_v54 = vld [vmem:[%s2320_s1 + $0xc0] ss:$8 sps:$4 sm:$0xff]   ;;  %v1610_v56 = vld [vmem:[%s2320_s1 + $0xd4] ss:$8 sps:$4 sm:$0xff]   ;;  %v1323_v6 = vcombine.low %v21_v46, %v21_v46  ;;  %v1327_v7 = vcombine.low %v23_v50, %v23_v50 }
  0x13   :  { %943 = vmatpush1.bf16.msra.mxu1 %v1560_v18  ;;  %v1606_v52 = vld [vmem:[%s2320_s1 + $0x2c4] ss:$8 sps:$4 sm:$0xff]   ;;  %v1609_v55 = vld [vmem:[%s2320_s1 + $0x2c0] ss:$8 sps:$4 sm:$0xff]   ;;  %v1612_v57 = vld [vmem:[%s2320_s1 + $0x2d4] ss:$8 sps:$4 sm:$0xff]  }
  0x14   :  { %1025 = vmatpush1.bf16.msra.mxu0 %v1561_v19  ;;  %944 = vmatprep.subr.bf16.mxu1 %v1562_v20  ;;  %v1614_v58 = vld [vmem:[%s2320_s1 + $0xd0] ss:$8 sps:$4 sm:$0xff]   ;;  %v1616_v60 = vld [vmem:[%s2320_s1 + $0xe4] ss:$8 sps:$4 sm:$0xff]   ;;  %v1620_v62 = vld [vmem:[%s2320_s1 + $0xe0] ss:$8 sps:$4 sm:$0xff]  }
  0x15   :  { %1026 = vmatprep.subr.bf16.mxu0 %v1564_v21  ;;  %966 = vmatprep.mubr.bf16.mxu1 %v1324_v48  ;;  %v1615_v59 = vld [vmem:[%s2320_s1 + $0x2d0] ss:$8 sps:$4 sm:$0xff]   ;;  %v1618_v61 = vld [vmem:[%s2320_s1 + $0x2e4] ss:$8 sps:$4 sm:$0xff]   ;;  %v1621_v63 = vld [vmem:[%s2320_s1 + $0x2e0] ss:$8 sps:$4 sm:$0xff]  }
  0x16   :  { %1048 = vmatprep.mubr.bf16.mxu0 %v1328_v53  ;;  %v1622_v0 = vld [vmem:[%s2320_s1 + $0xf4] ss:$8 sps:$4 sm:$0xff]   ;;  %v1626_v2 = vld [vmem:[%s2320_s1 + $0xf0] ss:$8 sps:$4 sm:$0xff]   ;;  %v1632_v4 = vld [vmem:[%s2320_s1 + $0x104] ss:$8 sps:$4 sm:$0xff]  }
  0x17   :  { %945 = vmatpush1.bf16.msra.mxu1 %v1566_v22  ;;  %v1624_v1 = vld [vmem:[%s2320_s1 + $0x2f4] ss:$8 sps:$4 sm:$0xff]   ;;  %v1627_v3 = vld [vmem:[%s2320_s1 + $0x2f0] ss:$8 sps:$4 sm:$0xff]   ;;  %v1637_v5 = vld [vmem:[%s2320_s1 + $0x304] ss:$8 sps:$4 sm:$0xff]  }
  0x18   :  { %1027 = vmatpush1.bf16.msra.mxu0 %v1567_v23  ;;  %946 = vmatprep.subr.bf16.mxu1 %v1568_v24  ;;  %v1630_v8 = vld [vmem:[%s2320_s1 + $0x100] ss:$8 sps:$4 sm:$0xff]   ;;  %v1640_v10 = vld [vmem:[%s2320_s1 + $0x114] ss:$8 sps:$4 sm:$0xff]   ;;  %v1638_v12 = vld [vmem:[%s2320_s1 + $0x110] ss:$8 sps:$4 sm:$0xff]  }
  0x19   :  { %1028 = vmatprep.subr.bf16.mxu0 %v1570_v25  ;;  %v1635_v9 = vld [vmem:[%s2320_s1 + $0x300] ss:$8 sps:$4 sm:$0xff]   ;;  %v1643_v11 = vld [vmem:[%s2320_s1 + $0x314] ss:$8 sps:$4 sm:$0xff]   ;;  %v1641_v13 = vld [vmem:[%s2320_s1 + $0x310] ss:$8 sps:$4 sm:$0xff]  }
  0x1a   :  { %v1646_v14 = vld [vmem:[%s2320_s1 + $0x124] ss:$8 sps:$4 sm:$0xff]   ;;  %v1644_v16 = vld [vmem:[%s2320_s1 + $0x120] ss:$8 sps:$4 sm:$0xff]   ;;  %v1652_v18 = vld [vmem:[%s2320_s1 + $0x134] ss:$8 sps:$4 sm:$0xff]  }
  0x1b   :  { %947 = vmatpush1.bf16.msra.mxu1 %v1572_v26  ;;  %v1649_v15 = vld [vmem:[%s2320_s1 + $0x324] ss:$8 sps:$4 sm:$0xff]   ;;  %v1647_v17 = vld [vmem:[%s2320_s1 + $0x320] ss:$8 sps:$4 sm:$0xff]   ;;  %v1655_v19 = vld [vmem:[%s2320_s1 + $0x334] ss:$8 sps:$4 sm:$0xff]  }
  0x1c   :  { %1029 = vmatpush1.bf16.msra.mxu0 %v1573_v27  ;;  %948 = vmatprep.subr.bf16.mxu1 %v1574_v28  ;;  %v1650_v20 = vld [vmem:[%s2320_s1 + $0x130] ss:$8 sps:$4 sm:$0xff]   ;;  %v1658_v22 = vld [vmem:[%s2320_s1 + $0x144] ss:$8 sps:$4 sm:$0xff]   ;;  %v1656_v24 = vld [vmem:[%s2320_s1 + $0x140] ss:$8 sps:$4 sm:$0xff]  }
  0x1d   :  { %1030 = vmatprep.subr.bf16.mxu0 %v1576_v29  ;;  %v1653_v21 = vld [vmem:[%s2320_s1 + $0x330] ss:$8 sps:$4 sm:$0xff]   ;;  %v1661_v23 = vld [vmem:[%s2320_s1 + $0x344] ss:$8 sps:$4 sm:$0xff]   ;;  %v1659_v25 = vld [vmem:[%s2320_s1 + $0x340] ss:$8 sps:$4 sm:$0xff]  }
  0x1e   :  { %v1664_v26 = vld [vmem:[%s2320_s1 + $0x154] ss:$8 sps:$4 sm:$0xff]   ;;  %v1662_v28 = vld [vmem:[%s2320_s1 + $0x150] ss:$8 sps:$4 sm:$0xff]   ;;  %v1694_v50 = vld [vmem:[%s2320_s1 + $0x1a4] ss:$8 sps:$4 sm:$0xff]  }
  0x1f   :  { %949 = vmatpush1.bf16.msra.mxu1 %v1578_v30  ;;  %v1667_v27 = vld [vmem:[%s2320_s1 + $0x354] ss:$8 sps:$4 sm:$0xff]   ;;  %v1665_v29 = vld [vmem:[%s2320_s1 + $0x350] ss:$8 sps:$4 sm:$0xff]   ;;  %v1670_v30 = vld [vmem:[%s2320_s1 + $0x164] ss:$8 sps:$4 sm:$0xff]  }
  0x20   :  { %1031 = vmatpush1.bf16.msra.mxu0 %v1579_v31  ;;  %950 = vmatprep.subr.bf16.mxu1 %v1580_v32  ;;  %v1673_v31 = vld [vmem:[%s2320_s1 + $0x364] ss:$8 sps:$4 sm:$0xff]   ;;  %v1688_v46 = vld [vmem:[%s2320_s1 + $0x194] ss:$8 sps:$4 sm:$0xff]   ;;  %v1686_v48 = vld [vmem:[%s2320_s1 + $0x190] ss:$8 sps:$4 sm:$0xff]  }
  0x21   :  { %1032 = vmatprep.subr.bf16.mxu0 %v1582_v33  ;;  %v2083_v32 = vld [vmem:[%s2321_s0 + $0x8] sm:$0xff]  ;;  %v2088_v33 = vld [vmem:[%s2321_s0 + $0x18] sm:$0xff] }
  0x22   :  { %v1695_v53 = vld [vmem:[%s2320_s1 + $0x3a0] ss:$8 sps:$4 sm:$0xff]  }
  0x23   :  { %951 = vmatpush1.bf16.msra.mxu1 %v1584_v34  ;;  %v1668_v34 = vld [vmem:[%s2320_s1 + $0x160] ss:$8 sps:$4 sm:$0xff]  }
  0x24   :  { %1033 = vmatpush1.bf16.msra.mxu0 %v1585_v35  ;;  %952 = vmatprep.subr.bf16.mxu1 %v1586_v36  ;;  %v1671_v35 = vld [vmem:[%s2320_s1 + $0x360] ss:$8 sps:$4 sm:$0xff]   ;;  %v1326_v36 = vcombine.high %v2083_v32, %v2083_v32 }
  0x25   :  { %1034 = vmatprep.subr.bf16.mxu0 %v1588_v37  ;;  %v1330_v37 = vcombine.high %v2088_v33, %v2088_v33 }
  0x27   :  { %953 = vmatpush1.bf16.msra.mxu1 %v1590_v38  ;;  %v1676_v38 = vld [vmem:[%s2320_s1 + $0x174] ss:$8 sps:$4 sm:$0xff]  }
  0x28   :  { %1035 = vmatpush1.bf16.msra.mxu0 %v1591_v39  ;;  %954 = vmatprep.subr.bf16.mxu1 %v1592_v40  ;;  %v1679_v39 = vld [vmem:[%s2320_s1 + $0x374] ss:$8 sps:$4 sm:$0xff]   ;;  %v1674_v40 = vld [vmem:[%s2320_s1 + $0x170] ss:$8 sps:$4 sm:$0xff]  }
  0x29   :  { %1036 = vmatprep.subr.bf16.mxu0 %v1594_v41  ;;  %v1677_v41 = vld [vmem:[%s2320_s1 + $0x370] ss:$8 sps:$4 sm:$0xff]  }
  0x2b   :  { %955 = vmatpush1.bf16.msra.mxu1 %v1596_v42  ;;  %v1682_v42 = vld [vmem:[%s2320_s1 + $0x184] ss:$8 sps:$4 sm:$0xff]  }
  0x2c   :  { %1037 = vmatpush1.bf16.msra.mxu0 %v1597_v43  ;;  %956 = vmatprep.subr.bf16.mxu1 %v1598_v44  ;;  %v1685_v43 = vld [vmem:[%s2320_s1 + $0x384] ss:$8 sps:$4 sm:$0xff]   ;;  %v1680_v44 = vld [vmem:[%s2320_s1 + $0x180] ss:$8 sps:$4 sm:$0xff]  }
  0x2d   :  { %1038 = vmatprep.subr.bf16.mxu0 %v1600_v45  ;;  %v1683_v45 = vld [vmem:[%s2320_s1 + $0x380] ss:$8 sps:$4 sm:$0xff]  }
  0x2f   :  { %957 = vmatpush1.bf16.msra.mxu1 %v1602_v47  ;;  %v1691_v47 = vld [vmem:[%s2320_s1 + $0x394] ss:$8 sps:$4 sm:$0xff]  }
  0x30   :  { %1039 = vmatpush1.bf16.msra.mxu0 %v1603_v49  ;;  %958 = vmatprep.subr.bf16.mxu1 %v1604_v51  ;;  %v1689_v49 = vld [vmem:[%s2320_s1 + $0x390] ss:$8 sps:$4 sm:$0xff]   ;;  %v1697_v51 = vld [vmem:[%s2320_s1 + $0x3a4] ss:$8 sps:$4 sm:$0xff]  }
  0x31   :  { %1040 = vmatprep.subr.bf16.mxu0 %v1606_v52  ;;  %v1692_v52 = vld [vmem:[%s2320_s1 + $0x1a0] ss:$8 sps:$4 sm:$0xff]  }
  0x33   :  { %959 = vmatpush1.bf16.msra.mxu1 %v1608_v54  ;;  %v1700_v54 = vld [vmem:[%s2320_s1 + $0x1b4] ss:$8 sps:$4 sm:$0xff]  }
  0x34   :  { %1041 = vmatpush1.bf16.msra.mxu0 %v1609_v55  ;;  %960 = vmatprep.subr.bf16.mxu1 %v1610_v56  ;;  %v1703_v55 = vld [vmem:[%s2320_s1 + $0x3b4] ss:$8 sps:$4 sm:$0xff]   ;;  %v1698_v56 = vld [vmem:[%s2320_s1 + $0x1b0] ss:$8 sps:$4 sm:$0xff]  }
  0x35   :  { %1042 = vmatprep.subr.bf16.mxu0 %v1612_v57  ;;  %v1701_v57 = vld [vmem:[%s2320_s1 + $0x3b0] ss:$8 sps:$4 sm:$0xff]  }
  0x37   :  { %961 = vmatpush1.bf16.msra.mxu1 %v1614_v58  ;;  %v1706_v58 = vld [vmem:[%s2320_s1 + $0x1c4] ss:$8 sps:$4 sm:$0xff]  }
  0x38   :  { %1043 = vmatpush1.bf16.msra.mxu0 %v1615_v59  ;;  %962 = vmatprep.subr.bf16.mxu1 %v1616_v60  ;;  %v1709_v59 = vld [vmem:[%s2320_s1 + $0x3c4] ss:$8 sps:$4 sm:$0xff]   ;;  %v1704_v60 = vld [vmem:[%s2320_s1 + $0x1c0] ss:$8 sps:$4 sm:$0xff]  }
  0x39   :  { %1044 = vmatprep.subr.bf16.mxu0 %v1618_v61  ;;  %v1707_v61 = vld [vmem:[%s2320_s1 + $0x3c0] ss:$8 sps:$4 sm:$0xff]  }
  0x3b   :  { %963 = vmatpush1.bf16.msra.mxu1 %v1620_v62  ;;  %v1712_v62 = vld [vmem:[%s2320_s1 + $0x1d4] ss:$8 sps:$4 sm:$0xff]  }
  0x3c   :  { %1045 = vmatpush1.bf16.msra.mxu0 %v1621_v63  ;;  %964 = vmatprep.subr.bf16.mxu1 %v1622_v0  ;;  %v1715_v63 = vld [vmem:[%s2320_s1 + $0x3d4] ss:$8 sps:$4 sm:$0xff]   ;;  %v1710_v0 = vld [vmem:[%s2320_s1 + $0x1d0] ss:$8 sps:$4 sm:$0xff]  }
  0x3d   :  { %1046 = vmatprep.subr.bf16.mxu0 %v1624_v1  ;;  %v1713_v1 = vld [vmem:[%s2320_s1 + $0x3d0] ss:$8 sps:$4 sm:$0xff]  }
  0x3f   :  { %965 = vmatpush1.bf16.msra.mxu1 %v1626_v2  ;;  %v1718_v2 = vld [vmem:[%s2320_s1 + $0x1e4] ss:$8 sps:$4 sm:$0xff]  }
  0x40   :  { %1047 = vmatpush1.bf16.msra.mxu0 %v1627_v3  ;;  %975 = vmatprep.subr.bf16.mxu1 %v1632_v4  ;;  %v1721_v3 = vld [vmem:[%s2320_s1 + $0x3e4] ss:$8 sps:$4 sm:$0xff]   ;;  %v1716_v4 = vld [vmem:[%s2320_s1 + $0x1e0] ss:$8 sps:$4 sm:$0xff]  }
  0x41   :  { %1057 = vmatprep.subr.bf16.mxu0 %v1637_v5  ;;  %v1719_v5 = vld [vmem:[%s2320_s1 + $0x3e0] ss:$8 sps:$4 sm:$0xff]  }
  0x42   :  { %967 = vmatmul.mubr.bf16.vlgmr.msra.gmra.mrb[0].mxu1 %v1323_v6  ;;  %v1724_v6 = vld [vmem:[%s2320_s1 + $0x1f4] ss:$8 sps:$4 sm:$0xff]  }
  0x43   :  { %1049 = vmatmul.mubr.bf16.vlgmr.msra.gmra.mrb[0].mxu0 %v1327_v7  ;;  %976 = vmatpush1.bf16.msra.mxu1 %v1630_v8  ;;  %v1727_v7 = vld [vmem:[%s2320_s1 + $0x3f4] ss:$8 sps:$4 sm:$0xff]   ;;  %v1722_v8 = vld [vmem:[%s2320_s1 + $0x1f0] ss:$8 sps:$4 sm:$0xff]  }
  0x44   :  { %1058 = vmatpush1.bf16.msra.mxu0 %v1635_v9  ;;  %977 = vmatprep.subr.bf16.mxu1 %v1640_v10  ;;  %v1725_v9 = vld [vmem:[%s2320_s1 + $0x3f0] ss:$8 sps:$4 sm:$0xff]   ;;  %v1734_v10 = vld [vmem:[%s2320_s1 + $0x404] ss:$8 sps:$4 sm:$0xff]  }
  0x45   :  { %1059 = vmatprep.subr.bf16.mxu0 %v1643_v11  ;;  %1007 = vmatprep.mubr.bf16.mxu1 %v1326_v36  ;;  %v1325_v11 = vcombine.low %v2083_v32, %v2083_v32  ;;  %v1759_v32 = vld [vmem:[%s2322_s3 + $0x48] sm:$0xff]   ;;  %v1763_v36 = vld [vmem:[%s2322_s3 + $0x58] sm:$0xff]  }
  0x46   :  { %1089 = vmatprep.mubr.bf16.mxu0 %v1330_v37  ;;  %v1764_v37 = vld [vmem:[%s2322_s3 + $0x18] sm:$0xff]  }
  0x47   :  { %978 = vmatpush1.bf16.msra.mxu1 %v1638_v12  ;;  %v1329_v12 = vcombine.low %v2088_v33, %v2088_v33  ;;  %v1760_v33 = vld [vmem:[%s2322_s3 + $0x8] sm:$0xff]  }
  0x48   :  { %1060 = vmatpush1.bf16.msra.mxu0 %v1641_v13  ;;  %979 = vmatprep.subr.bf16.mxu1 %v1646_v14  ;;  %v1732_v13 = vld [vmem:[%s2320_s1 + $0x400] ss:$8 sps:$4 sm:$0xff]   ;;  %v1737_v14 = vld [vmem:[%s2320_s1 + $0x414] ss:$8 sps:$4 sm:$0xff]  }
  0x49   :  { %1061 = vmatprep.subr.bf16.mxu0 %v1649_v15  ;;  %v1735_v15 = vld [vmem:[%s2320_s1 + $0x410] ss:$8 sps:$4 sm:$0xff]  }
  0x4b   :  { %980 = vmatpush1.bf16.msra.mxu1 %v1644_v16  ;;  %v1773_v16 = vmov 0  }
  0x4c   :  { %1062 = vmatpush1.bf16.msra.mxu0 %v1647_v17  ;;  %981 = vmatprep.subr.bf16.mxu1 %v1652_v18  ;;  %v1740_v17 = vld [vmem:[%s2320_s1 + $0x424] ss:$8 sps:$4 sm:$0xff]   ;;  %v1738_v18 = vld [vmem:[%s2320_s1 + $0x420] ss:$8 sps:$4 sm:$0xff]  }
  0x4d   :  { %1063 = vmatprep.subr.bf16.mxu0 %v1655_v19  ;;  %v1743_v19 = vld [vmem:[%s2320_s1 + $0x434] ss:$8 sps:$4 sm:$0xff]  }
  0x4f   :  { %982 = vmatpush1.bf16.msra.mxu1 %v1650_v20  ;;  %v1741_v20 = vld [vmem:[%s2320_s1 + $0x430] ss:$8 sps:$4 sm:$0xff]  }
  0x50   :  { %1064 = vmatpush1.bf16.msra.mxu0 %v1653_v21  ;;  %983 = vmatprep.subr.bf16.mxu1 %v1658_v22  ;;  %v1746_v21 = vld [vmem:[%s2320_s1 + $0x444] ss:$8 sps:$4 sm:$0xff]   ;;  %v1744_v22 = vld [vmem:[%s2320_s1 + $0x440] ss:$8 sps:$4 sm:$0xff]  }
  0x51   :  { %1065 = vmatprep.subr.bf16.mxu0 %v1661_v23  ;;  %v1749_v23 = vld [vmem:[%s2320_s1 + $0x454] ss:$8 sps:$4 sm:$0xff]  }
  0x53   :  { %984 = vmatpush1.bf16.msra.mxu1 %v1656_v24  ;;  %v1747_v24 = vld [vmem:[%s2320_s1 + $0x450] ss:$8 sps:$4 sm:$0xff]  }
  0x54   :  { %1066 = vmatpush1.bf16.msra.mxu0 %v1659_v25  ;;  %985 = vmatprep.subr.bf16.mxu1 %v1664_v26  ;;  %v1752_v25 = vld [vmem:[%s2320_s1 + $0x464] ss:$8 sps:$4 sm:$0xff]   ;;  %v1750_v26 = vld [vmem:[%s2320_s1 + $0x460] ss:$8 sps:$4 sm:$0xff]  }
  0x55   :  { %1067 = vmatprep.subr.bf16.mxu0 %v1667_v27  ;;  %v1755_v27 = vld [vmem:[%s2320_s1 + $0x474] ss:$8 sps:$4 sm:$0xff]  }
  0x57   :  { %986 = vmatpush1.bf16.msra.mxu1 %v1662_v28  ;;  %v1753_v28 = vld [vmem:[%s2320_s1 + $0x470] ss:$8 sps:$4 sm:$0xff]  }
  0x58   :  { %1068 = vmatpush1.bf16.msra.mxu0 %v1665_v29  ;;  %987 = vmatprep.subr.bf16.mxu1 %v1670_v30  ;;  %v1756_v29 = vld [vmem:[%s2321_s0 + $0x20] ss:$0 sps:$4 sm:$0xff]  }
  0x59   :  { %1069 = vmatprep.subr.bf16.mxu0 %v1673_v31  ;;  %v1757_v30 = vld [vmem:[%s2322_s3 + $0x40] sm:$0xff]  }
  0x5a   :  { %v1758_v31 = vld [vmem:[%s2322_s3] sm:$0xff]  }
  0x5b   :  { %988 = vmatpush1.bf16.msra.mxu1 %v1668_v34  ;;  %v1761_v34 = vld [vmem:[%s2322_s3 + $0x50] sm:$0xff]  }
  0x5c   :  { %1070 = vmatpush1.bf16.msra.mxu0 %v1671_v35  ;;  %989 = vmatprep.subr.bf16.mxu1 %v1676_v38  ;;  %v1762_v35 = vld [vmem:[%s2322_s3 + $0x10] sm:$0xff]   ;;  %v1765_v38 = vld [vmem:[%s2322_s3 + $0x60] sm:$0xff]  }
  0x5d   :  { %1071 = vmatprep.subr.bf16.mxu0 %v1679_v39  ;;  %v1766_v39 = vld [vmem:[%s2322_s3 + $0x20] sm:$0xff]  }
  0x5f   :  { %990 = vmatpush1.bf16.msra.mxu1 %v1674_v40  ;;  %v1767_v40 = vld [vmem:[%s2322_s3 + $0x68] sm:$0xff]  }
  0x60   :  { %1072 = vmatpush1.bf16.msra.mxu0 %v1677_v41  ;;  %991 = vmatprep.subr.bf16.mxu1 %v1682_v42  ;;  %v1768_v41 = vld [vmem:[%s2322_s3 + $0x28] sm:$0xff]   ;;  %v1769_v42 = vld [vmem:[%s2322_s3 + $0x70] sm:$0xff]  }
  0x61   :  { %1073 = vmatprep.subr.bf16.mxu0 %v1685_v43  ;;  %v1770_v43 = vld [vmem:[%s2322_s3 + $0x30] sm:$0xff]  }
  0x63   :  { %992 = vmatpush1.bf16.msra.mxu1 %v1680_v44  ;;  %v1771_v44 = vld [vmem:[%s2322_s3 + $0x78] sm:$0xff]  }
  0x64   :  { %1074 = vmatpush1.bf16.msra.mxu0 %v1683_v45  ;;  %993 = vmatprep.subr.bf16.mxu1 %v1688_v46  ;;  %v1772_v45 = vld [vmem:[%s2322_s3 + $0x38] sm:$0xff]  }
  0x65   :  { %1075 = vmatprep.subr.bf16.mxu0 %v1691_v47 }
  0x67   :  { %994 = vmatpush1.bf16.msra.mxu1 %v1686_v48 }
  0x68   :  { %1076 = vmatpush1.bf16.msra.mxu0 %v1689_v49  ;;  %995 = vmatprep.subr.bf16.mxu1 %v1694_v50  ;;  %v172_v50 = vlaneseq }
  0x69   :  { %1077 = vmatprep.subr.bf16.mxu0 %v1697_v51 }
  0x6a   :  { %v173_v51 = vshrl.u32 %v172_v50, 7 }
  0x6b   :  { %996 = vmatpush1.bf16.msra.mxu1 %v1692_v52 }
  0x6c   :  { %1078 = vmatpush1.bf16.msra.mxu0 %v1695_v53  ;;  %997 = vmatprep.subr.bf16.mxu1 %v1700_v54  ;;  %v174_v52 = vsub.s32 0, %v173_v51  ;;  %v170_v53 = vld [vmem:[%s2323_s2] sm:$0x3]  ;;  %v178_v54 = vsub.s32 1, %v173_v51 }
  0x6d   :  { %1079 = vmatprep.subr.bf16.mxu0 %v1703_v55 }
  0x6e   :  { %v175_v55 = vrot.slane %v170_v53, %v174_v52 }
  0x6f   :  { %998 = vmatpush1.bf16.msra.mxu1 %v1698_v56  ;;  %v179_v56 = vrot.slane %v170_v53, %v178_v54 }
  0x70   :  { %1080 = vmatpush1.bf16.msra.mxu0 %v1701_v57  ;;  %999 = vmatprep.subr.bf16.mxu1 %v1706_v58 }
  0x71   :  { %1081 = vmatprep.subr.bf16.mxu0 %v1709_v59 }
  0x73   :  { %1000 = vmatpush1.bf16.msra.mxu1 %v1704_v60 }
  0x74   :  { %1082 = vmatpush1.bf16.msra.mxu0 %v1707_v61  ;;  %1001 = vmatprep.subr.bf16.mxu1 %v1712_v62 }
  0x75   :  { %1083 = vmatprep.subr.bf16.mxu0 %v1715_v63 }
  0x77   :  { %1002 = vmatpush1.bf16.msra.mxu1 %v1710_v0 }
  0x78   :  { %1084 = vmatpush1.bf16.msra.mxu0 %v1713_v1  ;;  %1003 = vmatprep.subr.bf16.mxu1 %v1718_v2 }
  0x79   :  { %1085 = vmatprep.subr.bf16.mxu0 %v1721_v3 }
  0x7b   :  { %1004 = vmatpush1.bf16.msra.mxu1 %v1716_v4 }
  0x7c   :  { %1086 = vmatpush1.bf16.msra.mxu0 %v1719_v5  ;;  %1005 = vmatprep.subr.bf16.mxu1 %v1724_v6  ;;  %v1476_v6 = vld [vmem:[%s2324_s4] ss:$0 sm:$0xff] }
  0x7d   :  { %1087 = vmatprep.subr.bf16.mxu0 %v1727_v7 }
  0x7f   :  { %1006 = vmatpush1.bf16.msra.mxu1 %v1722_v8 }
  0x80   :  { %1088 = vmatpush1.bf16.msra.mxu0 %v1725_v9  ;;  %1493 = vmatprep.subr.bf16.mxu1 %v1757_v30 }
  0x81   :  { %1098 = vmatprep.subr.bf16.mxu0 %v1734_v10 }
  0x82   :  { %1008 = vmatmul.mubr.bf16.vlgmr.msra.gmra.mrb[0].mxu1 %v1325_v11 }
  0x83   :  { %1090 = vmatmul.mubr.bf16.vlgmr.msra.gmra.mrb[0].mxu0 %v1329_v12  ;;  %1494 = vmatpush3.bf16.msra.mxu1 %v1758_v31 }
  0x84   :  { %1099 = vmatpush1.bf16.msra.mxu0 %v1732_v13  ;;  %1130 = vmatprep.mubr.bf16.mxu0 %v1773_v16 }
  0x85   :  { %1100 = vmatprep.subr.bf16.mxu0 %v1737_v14  ;;  %1495 = vmatprep.subr.bf16.mxu1 %v1759_v32 }
  0x87   :  { %1496 = vmatpush3.bf16.msra.mxu1 %v1760_v33 }
  0x88   :  { %1101 = vmatpush1.bf16.msra.mxu0 %v1735_v15  ;;  %1497 = vmatprep.subr.bf16.mxu1 %v1761_v34 }
  0x89   :  { %1102 = vmatprep.subr.bf16.mxu0 %v1740_v17 }
  0x8b   :  { %1498 = vmatpush3.bf16.msra.mxu1 %v1762_v35 }
  0x8c   :  { %1103 = vmatpush1.bf16.msra.mxu0 %v1738_v18  ;;  %1499 = vmatprep.subr.bf16.mxu1 %v1763_v36 }
  0x8d   :  { %1104 = vmatprep.subr.bf16.mxu0 %v1743_v19 }
  0x8f   :  { %1500 = vmatpush3.bf16.msra.mxu1 %v1764_v37 }
  0x90   :  { %1105 = vmatpush1.bf16.msra.mxu0 %v1741_v20  ;;  %1501 = vmatprep.subr.bf16.mxu1 %v1765_v38 }
  0x91   :  { %1106 = vmatprep.subr.bf16.mxu0 %v1746_v21 }
  0x93   :  { %1502 = vmatpush3.bf16.msra.mxu1 %v1766_v39 }
  0x94   :  { %1107 = vmatpush1.bf16.msra.mxu0 %v1744_v22  ;;  %1503 = vmatprep.subr.bf16.mxu1 %v1767_v40 }
  0x95   :  { %1108 = vmatprep.subr.bf16.mxu0 %v1749_v23 }
  0x97   :  { %1504 = vmatpush3.bf16.msra.mxu1 %v1768_v41 }
  0x98   :  { %1109 = vmatpush1.bf16.msra.mxu0 %v1747_v24  ;;  %1505 = vmatprep.subr.bf16.mxu1 %v1769_v42 }
  0x99   :  { %1110 = vmatprep.subr.bf16.mxu0 %v1752_v25 }
  0x9b   :  { %1506 = vmatpush3.bf16.msra.mxu1 %v1770_v43 }
  0x9c   :  { %1111 = vmatpush1.bf16.msra.mxu0 %v1750_v26  ;;  %1507 = vmatprep.subr.bf16.mxu1 %v1771_v44 }
  0x9d   :  { %1112 = vmatprep.subr.bf16.mxu0 %v1755_v27 }
  0x9f   :  { %1508 = vmatpush3.bf16.msra.mxu1 %v1772_v45 }
  0xa0   :  { %1113 = vmatpush1.bf16.msra.mxu0 %v1753_v28 }
  0xa3   :  { %1131 = vmatmul.mubr.bf16.vlgmr.msra.gmra.mrb[0].mxu0 %v1756_v29 }
 0x155   :  { %v1009_v46 = vpop.f32.mrb[0].mxu1 }
 0x156   :  { %v1011_v47 = vpop.f32.mrb[1].mxu1  ;;  %v1515_v57 = vadd.f32 %v1009_v46, %v175_v55 }
 0x157   :  { %v1013_v48 = vpop.f32.mrb[2].mxu1  ;;  %v1517_v58 = vadd.f32 %v1011_v47, %v179_v56 }
 0x158   :  { %v1014_v49 = vpop.f32.mrb[3].mxu1 }
 0x176   :  { %v1132_v59 = vpop.f32.mrb[0].mxu0 }
 0x177   :  { %v1516_v60 = vadd.f32 %v1515_v57, %v1132_v59  ;;  %v1134_v61 = vpop.f32.mrb[1].mxu0 }
 0x178   :  { %v1518_v62 = vadd.f32 %v1517_v58, %v1134_v61  ;;  %v1136_v63 = vpop.f32.mrb[2].mxu0 }
 0x179   :  { %v1139_v0 = vmax.f32 %v1516_v60, 0.0  ;;  %v1137_v1 = vpop.f32.mrb[3].mxu0 }
 0x17a   :  { %v1140_v2 = vmax.f32 %v1518_v62, 0.0 }
 0x17b   :  { %v1141_v4 = vpack.c.bf16 %v1139_v0, %v1139_v0 }
 0x17c   :  { %v1142_v3 = vpack.c.bf16 %v1140_v2, %v1140_v2 }
 0x17e   :  { %1310 = vmatprep.mubr.bf16.mxu1 %v1142_v3 }
 0x17f   :  { %1311 = vmatmul.mubr.bf16.vlgmr.msra.gmra.mrb[4].mxu1 %v1141_v4 }
 0x252   :  { %v1509_v5 = vpop.f32.mrb[4].mxu1 }
 0x253   :  { %v1510_v7 = vpop.f32.mrb[5].mxu1 }
 0x254   :  { %v1511_v8 = vadd.f32 %v1510_v7, %v1509_v5  ;;  %v1512_v9 = vpop.f32.mrb[6].mxu1 }
 0x255   :  { %v1513_v10 = vpop.f32.mrb[7].mxu1 }
 0x256   :  { %v1313_v11 = vadd.f32 %v1511_v8, %v1476_v6 }
 0x258   :  { %1318 = vst [vmem:[%s2325_s5] sm:$0xff] %v1313_v11 }

</bundles_post_ra>
